<compile_context>
chip_gen: v6e
topology: v6e:2x2x1
jax: 0.10.0
libtpu: 0.0.40
codegen_flags: <defaults>
</compile_context>

<pallas_src>
import functools

import jax
import jax.numpy as jnp
from jax.experimental import pallas as pl
from jax.experimental.pallas import tpu as pltpu

N_ACTIONS = 2
L_IN, C_IN = 21, 3          # 21 hand points, 3 coords (conv in-channels)
K1, C1_OUT = 5, 10          # conv1: Conv1d(3, 10, kernel_size=5)
K2, C2_OUT = 4, 10          # conv2: Conv1d(10, 10, kernel_size=4)
L1 = L_IN - K1 + 1          # 17
L2 = L1 - K2 + 1            # 14  -> MaxPool1d(kernel_size=14) pools to length 1
STATE = 66                  # 63 flat hand-point coords + 3 dis features

POOL_COLS = L2 * C2_OUT     # 140 : folded-conv output columns (pos-major, chan-minor)
POOL_PAD = 160              # 16 groups of 10 -> power-of-two binary max tree
FUSED = POOL_PAD + 10       # 170 : [conv 140 | pad 20 | dis-fc1 10]
NEG_BIG = -1e30             # finite "minus infinity" for the pool padding groups


def net_kernel(x_ref, wf_ref, bf_ref, fw2_ref, fb2_ref,
               fcwp_ref, fcwh_ref, fcb_ref, out_ref):
    x = x_ref[...]                                                   # (TB, 66)

    # Single fused matmul: folded conv1∘conv2 + dis fc1, bias in f32.
    y = jnp.dot(x, wf_ref[...],
                preferred_element_type=jnp.float32) + bf_ref[...]    # (TB, 170) f32

    # MaxPool1d over the 14 conv positions: binary max tree on lane groups of 10
    # (groups 14/15 hold -1e30 pad).  No (TB,14,10) reshape/relayout.
    p = y[:, :POOL_PAD]                                              # (TB, 160)
    p = jnp.maximum(p[:, :80], p[:, 80:])                            # 16 -> 8 groups
    p = jnp.maximum(p[:, :40], p[:, 40:])                            # 8  -> 4
    p = jnp.maximum(p[:, :20], p[:, 20:])                            # 4  -> 2
    pool = jnp.maximum(p[:, :10], p[:, 10:])                         # (TB, 10) f32

    # dis branch: fc1 (incl. bias) already lives in y's last 10 columns.
    w2v = fw2_ref[...]
    h = jnp.maximum(y[:, POOL_PAD:], 0.0)                            # relu(fc1(dis))
    h = jnp.maximum(
        jnp.dot(h.astype(w2v.dtype), w2v,
                preferred_element_type=jnp.float32) + fb2_ref[...], 0.0)

    # final Linear(20, 2): concat folded into two summed matmuls.
    wp = fcwp_ref[...]
    wh = fcwh_ref[...]
    out_ref[...] = (jnp.dot(pool.astype(wp.dtype), wp, preferred_element_type=jnp.float32)
                    + jnp.dot(h.astype(wh.dtype), wh, preferred_element_type=jnp.float32)
                    + fcb_ref[...]).astype(out_ref.dtype)


def prepare_kernel_params(params, compute_dtype=jnp.bfloat16):
    """Fold module weights into the kernel's fused forms.  Call ONCE (not per forward).

    conv weights come in as (K, Cin, Cout) (= torch (Cout, Cin, K) transposed),
    linear weights as (in, out) (= torch weight.T)."""
    w1, b1, w2, b2, fw1, fb1, fw2, fb2, fcw, fcb = [
        jnp.asarray(p, jnp.float32) for p in params]

    # conv1 -> block-Toeplitz (66, 170); rows 63..65 (dis) stay zero.
    w1f = w1.reshape(K1 * C_IN, C1_OUT)                              # (15, 10)
    W1 = jnp.zeros((STATE, L1 * C1_OUT), jnp.float32)
    for t in range(L1):
        W1 = W1.at[t * C_IN:t * C_IN + K1 * C_IN,
                   t * C1_OUT:(t + 1) * C1_OUT].set(w1f)
    b1t = jnp.tile(b1.reshape(1, C1_OUT), (1, L1))                   # (1, 170)

    # conv2 -> block-Toeplitz (170, 140)
    w2f = w2.reshape(K2 * C1_OUT, C2_OUT)                            # (40, 10)
    W2 = jnp.zeros((L1 * C1_OUT, L2 * C2_OUT), jnp.float32)
    for t in range(L2):
        W2 = W2.at[t * C1_OUT:t * C1_OUT + K2 * C1_OUT,
                   t * C2_OUT:(t + 1) * C2_OUT].set(w2f)
    b2t = jnp.tile(b2.reshape(1, C2_OUT), (1, L2))                   # (1, 140)

    # Fold conv1 into conv2 (no nonlinearity between them in the torch forward).
    Wc = W1 @ W2                                                     # (66, 140)
    bc = b1t @ W2 + b2t                                              # (1, 140)

    # Fused x-consuming weight/bias: [conv 0:140 | pool pad 140:160 | dis fc1 160:170]
    WF = jnp.zeros((STATE, FUSED), jnp.float32)
    WF = WF.at[:, :POOL_COLS].set(Wc)
    WF = WF.at[63:66, POOL_PAD:POOL_PAD + 10].set(fw1)
    BF = jnp.zeros((1, FUSED), jnp.float32)
    BF = BF.at[:, :POOL_COLS].set(bc)
    BF = BF.at[:, POOL_COLS:POOL_PAD].set(NEG_BIG)
    BF = BF.at[:, POOL_PAD:POOL_PAD + 10].set(fb1)

    # Final fc split: out = pool @ fcw[:10] + h @ fcw[10:] + fcb
    fcw_pool = fcw[:C2_OUT]
    fcw_dis = fcw[C2_OUT:]

    cd = compute_dtype   # matmul operands; biases stay f32 (added post-MXU on the VPU)
    return (WF.astype(cd), BF, fw2.astype(cd), fb2,
            fcw_pool.astype(cd), fcw_dis.astype(cd), fcb)


@functools.partial(jax.jit, static_argnames=("tb",))
def net_approximator_forward(x, kparams, *, tb=2048):
    """x: (B, 66) flat state (63 hand-point coords + 3 dis). kparams: prepare_kernel_params()."""
    wf = kparams[0]
    x = x.astype(wf.dtype)               # bf16 by default -> halves the dominant input DMA
    B = x.shape[0]

    if B <= 256 and B <= tb:
        TB = B                           # single full-size block (dim-exempt from 8-row rule)
    else:
        # >=2 sublane-aligned tiles (keeps both v7x TensorCores busy), capped at tb.
        TB = min(max(8, (tb // 8) * 8), ((pl.cdiv(B, 2) + 7) // 8) * 8)

    in_specs = [pl.BlockSpec((TB, STATE), lambda i: (i, 0))]         # x: tiled over batch
    in_specs += [pl.BlockSpec(p.shape, lambda i: (0, 0))             # weights: VMEM-resident
                 for p in kparams]

    return pl.pallas_call(
        net_kernel,
        out_shape=jax.ShapeDtypeStruct((B, N_ACTIONS), jnp.float32),
        grid=(pl.cdiv(B, TB),),                                      # Pallas masks ragged edge
        in_specs=in_specs,
        out_specs=pl.BlockSpec((TB, N_ACTIONS), lambda i: (i, 0)),
        compiler_params=pltpu.CompilerParams(
            dimension_semantics=("parallel",),                       # shard batch tiles over TCs
            vmem_limit_bytes=32 * 1024 * 1024),
    )(x, *kparams)


def init_params(key):
    """Deterministic synthetic weights (shapes follow NetApproximator.__init__).
    Conv weights stored as (K, Cin, Cout); Linear weights stored as (in, out)."""
    ks = jax.random.split(key, 10)
    s = 0.1
    w1 = s * jax.random.normal(ks[0], (K1, C_IN, C1_OUT), jnp.float32)
    b1 = s * jax.random.normal(ks[1], (1, C1_OUT), jnp.float32)
    w2 = s * jax.random.normal(ks[2], (K2, C1_OUT, C2_OUT), jnp.float32)
    b2 = s * jax.random.normal(ks[3], (1, C2_OUT), jnp.float32)
    fw1 = s * jax.random.normal(ks[4], (3, 10), jnp.float32)
    fb1 = s * jax.random.normal(ks[5], (1, 10), jnp.float32)
    fw2 = s * jax.random.normal(ks[6], (10, 10), jnp.float32)
    fb2 = s * jax.random.normal(ks[7], (1, 10), jnp.float32)
    fcw = s * jax.random.normal(ks[8], (20, N_ACTIONS), jnp.float32)
    fcb = s * jax.random.normal(ks[9], (1, N_ACTIONS), jnp.float32)
    return (w1, b1, w2, b2, fw1, fb1, fw2, fb2, fcw, fcb)


def reference_forward(x, params):
    """Pure-JAX reference mirroring the PyTorch forward (for correctness check)."""
    w1, b1, w2, b2, fw1, fb1, fw2, fb2, fcw, fcb = params
    B = x.shape[0]
    hp = x[:, :63].reshape(B, L_IN, C_IN)
    dis = x[:, 63:66]
    dn = ('NWC', 'WIO', 'NWC')
    c1 = jax.lax.conv_general_dilated(hp, w1, (1,), 'VALID', dimension_numbers=dn) + b1
    c2 = jax.lax.conv_general_dilated(c1, w2, (1,), 'VALID', dimension_numbers=dn) + b2
    pool = c2.max(axis=1)
    h = jax.nn.relu(dis @ fw1 + fb1)
    h = jax.nn.relu(h @ fw2 + fb2)
    return jnp.concatenate([pool, h], axis=1) @ fcw + fcb


if __name__ == "__main__":
    key = jax.random.PRNGKey(0)
    kx, kx2, kp = jax.random.split(key, 3)
    params = init_params(kp)

    # Folded weights are computed ONCE (outside the jitted forward) and reused.
    kparams_f32 = prepare_kernel_params(params, jnp.float32)    # validation path
    kparams_bf16 = prepare_kernel_params(params, jnp.bfloat16)  # fast (default) path

    # Small single-block case.
    B = 4
    x = jax.random.normal(kx, (B, STATE), jnp.float32)
    ref = reference_forward(x, params)

    out = jax.block_until_ready(net_approximator_forward(x, kparams_f32))
    assert out.shape == (B, N_ACTIONS)
    if not jnp.allclose(out, ref, rtol=1e-4, atol=1e-4):
        raise AssertionError("Pallas kernel (f32) mismatch vs JAX reference (B=4)")

    out_bf = jax.block_until_ready(net_approximator_forward(x, kparams_bf16))
    if not jnp.allclose(out_bf, ref, rtol=2e-2, atol=2e-2):
        raise AssertionError("Pallas kernel (bf16) mismatch vs JAX reference (B=4)")

    # Tiled / ragged case (exercises the batch grid + masked edge block, no padding copy).
    B2 = 200
    x2 = jax.random.normal(kx2, (B2, STATE), jnp.float32)
    ref2 = reference_forward(x2, params)

    out2 = jax.block_until_ready(net_approximator_forward(x2, kparams_f32, tb=64))
    assert out2.shape == (B2, N_ACTIONS)
    if not jnp.allclose(out2, ref2, rtol=1e-4, atol=1e-4):
        raise AssertionError("Pallas kernel (f32) mismatch vs JAX reference (B=200, tiled)")

    out2_bf = jax.block_until_ready(net_approximator_forward(x2, kparams_bf16, tb=64))
    if not jnp.allclose(out2_bf, ref2, rtol=2e-2, atol=2e-2):
        raise AssertionError("Pallas kernel (bf16) mismatch vs JAX reference (B=200, tiled)")

    print("KERNEL_OK")
</pallas_src>

<mosaic_0001>
module attributes {stable_mosaic.version = 11 : i64} {
  func.func @net_kernel(%arg0: i32, %arg1: memref<4x66xf32, #tpu.memory_space<vmem>>, %arg2: memref<66x170xf32, #tpu.memory_space<vmem>>, %arg3: memref<1x170xf32, #tpu.memory_space<vmem>>, %arg4: memref<10x10xf32, #tpu.memory_space<vmem>>, %arg5: memref<1x10xf32, #tpu.memory_space<vmem>>, %arg6: memref<10x2xf32, #tpu.memory_space<vmem>>, %arg7: memref<10x2xf32, #tpu.memory_space<vmem>>, %arg8: memref<1x2xf32, #tpu.memory_space<vmem>>, %arg9: memref<4x2xf32, #tpu.memory_space<vmem>>) attributes {dimension_semantics = [#tpu.dimension_semantics<parallel>], iteration_bounds = array<i64: 1>, scalar_prefetch = 0 : i64, scratch_operands = 0 : i64, tpu.core_type = #tpu.core_type<tc>, window_params = [{transform_indices = @transform_0, window_bounds = array<i64: 4, 66>}, {pipeline_mode = #tpu.pipeline_mode<synchronous>, transform_indices = @transform_1, window_bounds = array<i64: 66, 170>}, {pipeline_mode = #tpu.pipeline_mode<synchronous>, transform_indices = @transform_2, window_bounds = array<i64: 1, 170>}, {pipeline_mode = #tpu.pipeline_mode<synchronous>, transform_indices = @transform_3, window_bounds = array<i64: 10, 10>}, {pipeline_mode = #tpu.pipeline_mode<synchronous>, transform_indices = @transform_4, window_bounds = array<i64: 1, 10>}, {pipeline_mode = #tpu.pipeline_mode<synchronous>, transform_indices = @transform_5, window_bounds = array<i64: 10, 2>}, {pipeline_mode = #tpu.pipeline_mode<synchronous>, transform_indices = @transform_6, window_bounds = array<i64: 10, 2>}, {pipeline_mode = #tpu.pipeline_mode<synchronous>, transform_indices = @transform_7, window_bounds = array<i64: 1, 2>}, {transform_indices = @transform_8, window_bounds = array<i64: 4, 2>}]} {
    %c0 = arith.constant 0 : index
    %c0_0 = arith.constant 0 : index
    %0 = vector.load %arg1[%c0, %c0_0] : memref<4x66xf32, #tpu.memory_space<vmem>>, vector<4x66xf32>
    %c0_1 = arith.constant 0 : index
    %c0_2 = arith.constant 0 : index
    %1 = vector.load %arg2[%c0_1, %c0_2] : memref<66x170xf32, #tpu.memory_space<vmem>>, vector<66x170xf32>
    %cst = arith.constant dense<0.000000e+00> : vector<4x170xf32>
    %2 = tpu.matmul %0, %1, %cst {dimension_numbers = #tpu.dot_dimension_numbers<[1], [0], [0], [1], [0, 0, 1, 1], [], []>} : vector<4x66xf32>, vector<66x170xf32>, vector<4x170xf32> -> vector<4x170xf32>
    %c0_3 = arith.constant 0 : index
    %c0_4 = arith.constant 0 : index
    %3 = vector.load %arg3[%c0_3, %c0_4] : memref<1x170xf32, #tpu.memory_space<vmem>>, vector<1x170xf32>
    %4 = vector.broadcast %3 : vector<1x170xf32> to vector<4x170xf32>
    %5 = arith.addf %2, %4 : vector<4x170xf32>
    %6 = vector.extract_strided_slice %5 {offsets = [0, 0], sizes = [4, 160], strides = [1, 1]} : vector<4x170xf32> to vector<4x160xf32>
    %7 = vector.extract_strided_slice %6 {offsets = [0, 0], sizes = [4, 80], strides = [1, 1]} : vector<4x160xf32> to vector<4x80xf32>
    %8 = vector.extract_strided_slice %6 {offsets = [0, 80], sizes = [4, 80], strides = [1, 1]} : vector<4x160xf32> to vector<4x80xf32>
    %9 = arith.maximumf %7, %8 : vector<4x80xf32>
    %10 = vector.extract_strided_slice %9 {offsets = [0, 0], sizes = [4, 40], strides = [1, 1]} : vector<4x80xf32> to vector<4x40xf32>
    %11 = vector.extract_strided_slice %9 {offsets = [0, 40], sizes = [4, 40], strides = [1, 1]} : vector<4x80xf32> to vector<4x40xf32>
    %12 = arith.maximumf %10, %11 : vector<4x40xf32>
    %13 = vector.extract_strided_slice %12 {offsets = [0, 0], sizes = [4, 20], strides = [1, 1]} : vector<4x40xf32> to vector<4x20xf32>
    %14 = vector.extract_strided_slice %12 {offsets = [0, 20], sizes = [4, 20], strides = [1, 1]} : vector<4x40xf32> to vector<4x20xf32>
    %15 = arith.maximumf %13, %14 : vector<4x20xf32>
    %16 = vector.extract_strided_slice %15 {offsets = [0, 0], sizes = [4, 10], strides = [1, 1]} : vector<4x20xf32> to vector<4x10xf32>
    %17 = vector.extract_strided_slice %15 {offsets = [0, 10], sizes = [4, 10], strides = [1, 1]} : vector<4x20xf32> to vector<4x10xf32>
    %18 = arith.maximumf %16, %17 : vector<4x10xf32>
    %c0_5 = arith.constant 0 : index
    %c0_6 = arith.constant 0 : index
    %19 = vector.load %arg4[%c0_5, %c0_6] : memref<10x10xf32, #tpu.memory_space<vmem>>, vector<10x10xf32>
    %20 = vector.extract_strided_slice %5 {offsets = [0, 160], sizes = [4, 10], strides = [1, 1]} : vector<4x170xf32> to vector<4x10xf32>
    %cst_7 = arith.constant 0.000000e+00 : f32
    %21 = vector.broadcast %cst_7 : f32 to vector<4x10xf32>
    %22 = arith.maximumf %20, %21 : vector<4x10xf32>
    %cst_8 = arith.constant dense<0.000000e+00> : vector<4x10xf32>
    %23 = tpu.matmul %22, %19, %cst_8 {dimension_numbers = #tpu.dot_dimension_numbers<[1], [0], [0], [1], [0, 0, 1, 1], [], []>} : vector<4x10xf32>, vector<10x10xf32>, vector<4x10xf32> -> vector<4x10xf32>
    %c0_9 = arith.constant 0 : index
    %c0_10 = arith.constant 0 : index
    %24 = vector.load %arg5[%c0_9, %c0_10] : memref<1x10xf32, #tpu.memory_space<vmem>>, vector<1x10xf32>
    %25 = vector.broadcast %24 : vector<1x10xf32> to vector<4x10xf32>
    %26 = arith.addf %23, %25 : vector<4x10xf32>
    %cst_11 = arith.constant 0.000000e+00 : f32
    %27 = vector.broadcast %cst_11 : f32 to vector<4x10xf32>
    %28 = arith.maximumf %26, %27 : vector<4x10xf32>
    %c0_12 = arith.constant 0 : index
    %c0_13 = arith.constant 0 : index
    %29 = vector.load %arg6[%c0_12, %c0_13] : memref<10x2xf32, #tpu.memory_space<vmem>>, vector<10x2xf32>
    %c0_14 = arith.constant 0 : index
    %c0_15 = arith.constant 0 : index
    %30 = vector.load %arg7[%c0_14, %c0_15] : memref<10x2xf32, #tpu.memory_space<vmem>>, vector<10x2xf32>
    %cst_16 = arith.constant dense<0.000000e+00> : vector<4x2xf32>
    %31 = tpu.matmul %18, %29, %cst_16 {dimension_numbers = #tpu.dot_dimension_numbers<[1], [0], [0], [1], [0, 0, 1, 1], [], []>} : vector<4x10xf32>, vector<10x2xf32>, vector<4x2xf32> -> vector<4x2xf32>
    %cst_17 = arith.constant dense<0.000000e+00> : vector<4x2xf32>
    %32 = tpu.matmul %28, %30, %cst_17 {dimension_numbers = #tpu.dot_dimension_numbers<[1], [0], [0], [1], [0, 0, 1, 1], [], []>} : vector<4x10xf32>, vector<10x2xf32>, vector<4x2xf32> -> vector<4x2xf32>
    %33 = arith.addf %31, %32 : vector<4x2xf32>
    %c0_18 = arith.constant 0 : index
    %c0_19 = arith.constant 0 : index
    %34 = vector.load %arg8[%c0_18, %c0_19] : memref<1x2xf32, #tpu.memory_space<vmem>>, vector<1x2xf32>
    %35 = vector.broadcast %34 : vector<1x2xf32> to vector<4x2xf32>
    %36 = arith.addf %33, %35 : vector<4x2xf32>
    %c0_20 = arith.constant 0 : index
    %c0_21 = arith.constant 0 : index
    %37 = vector.load %arg9[%c0_20, %c0_21] : memref<4x2xf32, #tpu.memory_space<vmem>>, vector<4x2xf32>
    tpu.vector_store %arg9[%c0_20, %c0_21], %36 {strides = array<i32>} : memref<4x2xf32, #tpu.memory_space<vmem>>, vector<4x2xf32>,
    return
  }
  func.func @transform_0(%arg0: i32) -> (i32, i32) {
    %c0_i32 = arith.constant 0 : i32
    %c0_i32_0 = arith.constant 0 : i32
    return %arg0, %c0_i32 : i32, i32
  }
  func.func @transform_1(%arg0: i32) -> (i32, i32) {
    %c0_i32 = arith.constant 0 : i32
    %c0_i32_0 = arith.constant 0 : i32
    %c0_i32_1 = arith.constant 0 : i32
    return %c0_i32, %c0_i32_0 : i32, i32
  }
  func.func @transform_2(%arg0: i32) -> (i32, i32) {
    %c0_i32 = arith.constant 0 : i32
    %c0_i32_0 = arith.constant 0 : i32
    %c0_i32_1 = arith.constant 0 : i32
    return %c0_i32, %c0_i32_0 : i32, i32
  }
  func.func @transform_3(%arg0: i32) -> (i32, i32) {
    %c0_i32 = arith.constant 0 : i32
    %c0_i32_0 = arith.constant 0 : i32
    %c0_i32_1 = arith.constant 0 : i32
    return %c0_i32, %c0_i32_0 : i32, i32
  }
  func.func @transform_4(%arg0: i32) -> (i32, i32) {
    %c0_i32 = arith.constant 0 : i32
    %c0_i32_0 = arith.constant 0 : i32
    %c0_i32_1 = arith.constant 0 : i32
    return %c0_i32, %c0_i32_0 : i32, i32
  }
  func.func @transform_5(%arg0: i32) -> (i32, i32) {
    %c0_i32 = arith.constant 0 : i32
    %c0_i32_0 = arith.constant 0 : i32
    %c0_i32_1 = arith.constant 0 : i32
    return %c0_i32, %c0_i32_0 : i32, i32
  }
  func.func @transform_6(%arg0: i32) -> (i32, i32) {
    %c0_i32 = arith.constant 0 : i32
    %c0_i32_0 = arith.constant 0 : i32
    %c0_i32_1 = arith.constant 0 : i32
    return %c0_i32, %c0_i32_0 : i32, i32
  }
  func.func @transform_7(%arg0: i32) -> (i32, i32) {
    %c0_i32 = arith.constant 0 : i32
    %c0_i32_0 = arith.constant 0 : i32
    %c0_i32_1 = arith.constant 0 : i32
    return %c0_i32, %c0_i32_0 : i32, i32
  }
  func.func @transform_8(%arg0: i32) -> (i32, i32) {
    %c0_i32 = arith.constant 0 : i32
    %c0_i32_0 = arith.constant 0 : i32
    return %arg0, %c0_i32 : i32, i32
  }
}

</mosaic_0001>

<bundles_post_ra>
// kernel: net_approximator_forward.1
= control target key start
LH: loop header
LB: loop body
LE: loop exit
PB: predicated region body
PF: predicated region fallthrough
CT: control target
= control target key end

     0   :  { %13 = vsyncpa [#allocation3], 0  ;;  %s515_s27 = smov [#allocation2]   ;;  %s627_s0 = inlined_call_operand.vmem [shape: f32[4,66], index: 0, kind: input, shape index: {}]   ;;  %s628_s1 = inlined_call_operand.hbm [shape: f32[66,170], index: 1, kind: input, shape index: {}]   ;;  %s629_s2 = inlined_call_operand.vmem [shape: f32[1,170], index: 2, kind: input, shape index: {}]   ;;  %s630_s3 = inlined_call_operand.vmem [shape: f32[10,10], index: 3, kind: input, shape index: {}]   ;;  %s631_s4 = inlined_call_operand.vmem [shape: f32[1,10], index: 4, kind: input, shape index: {}]   ;;  %s632_s5 = inlined_call_operand.vmem [shape: f32[10,2], index: 5, kind: input, shape index: {}]   ;;  %s633_s6 = inlined_call_operand.vmem [shape: f32[10,2], index: 6, kind: input, shape index: {}]   ;;  %s634_s7 = inlined_call_operand.vmem [shape: f32[1,2], index: 7, kind: input, shape index: {}]   ;;  %s635_s8 = inlined_call_operand.vmem [shape: f32[4,2], index: 8, kind: output, shape index: {}]  }
   0x1   :  { %s21_s28 = sshll.u32 %s515_s27, 4  ;;  %s22_s28 = int_to_ptr.vmem [resolvable:$true] %s21_s28 }
   0x2   :  { %s501_s29 = scalar_lea.vmem %s22_s28, 2304  ;;  %p506_p1 = scmp.lt.s32.totalorder %s22_s28, %s22_s28 }
   0x3   :  { %p502_p0 = scmp.ne.s32.totalorder %s22_s28, %s501_s29  ;;  %p507_p2 = scmp.lt.s32.totalorder %s501_s29, %s501_s29 }
   0x5   :  { %p508_p3 = por %p507_p2, %p506_p1 }
   0x7   :  { %p509_p4 = pnand %p508_p3, %p502_p0 }
   0x9   :  { %512 = shalt.err (!%p509_p4)
}
   0xa   :  { %s516_s30 = smov 256   ;;  %s517_s9 = smov 16  }
   0xb   :  { %27 = dma.hbm_to_vmem [thread:$0]  %s628_s1, 2304, %s22_s28, [#allocation3], %s516_s30, %s516_s30, %s517_s9  }
   0xc   :  { %513 = dma.done.wait [#allocation3], 2304  }
   0xd   :  { %514 = vsyncadd [#allocation3], 4294964992  ;;  %v518_v0 = vmov 0.0   ;;  %vm78_vm0 = vcmask 1041408   ;;  %v61_v1 = vld [vmem:[#allocation2 + $0x88] sm:$0x3]  ;;  %v64_v21 = vlaneseq }
   0xe   :  { %149 = vmatprep.mubr.f32.mxu0 %v518_v0  ;;  %462 = vmatprep.subr.mxu1 %v518_v0  ;;  %v60_v2 = vld [vmem:[#allocation2 + $0x80] sm:$0x3]  ;;  %v59_v3 = vld [vmem:[#allocation2 + $0x78] sm:$0xff]  ;;  %v58_v4 = vld [vmem:[#allocation2 + $0x70] sm:$0xff]  ;;  %vm74_vm1 = vcmask 539648   ;;  %vm519_vm2 = vmmov 0  }
   0xf   :  { %442 = vmatprep.subr.msk.mxu0 %vm78_vm0, %v61_v1  ;;  %v57_v5 = vld [vmem:[#allocation2 + $0x68] sm:$0xff]  ;;  %v56_v6 = vld [vmem:[#allocation2 + $0x60] sm:$0xff]  ;;  %v55_v7 = vld [vmem:[#allocation2 + $0x58] sm:$0xff]  ;;  %466 = vmatprep.mubr.msk.f32.mxu1 %vm519_vm2, %v518_v0  ;;  %v65_v23 = vshrl.u32 %v64_v21, 7  ;;  %s521_s18 = smov 96   ;;  %vm194_vm3 = vcmask 80896  }
  0x10   :  { %443 = vmatpush1.msk.msra.mxu0 %vm78_vm0, %v60_v2  ;;  %v54_v8 = vld [vmem:[#allocation2 + $0x50] sm:$0xff]  ;;  %v53_v9 = vld [vmem:[#allocation2 + $0x48] sm:$0xff]  ;;  %v52_v10 = vld [vmem:[#allocation2 + $0x40] sm:$0xff]  ;;  %vm162_vm4 = vcmask 392192   ;;  %s523_s23 = smov 108   ;;  %vm435_vm5 = vcmask 11264  }
  0x11   :  { %101 = vmatprep.subr.mxu0 %v59_v3  ;;  %v51_v11 = vld [vmem:[#allocation2 + $0x38] sm:$0xff]  ;;  %v50_v12 = vld [vmem:[#allocation2 + $0x30] sm:$0xff]  ;;  %v49_v13 = vld [vmem:[#allocation2 + $0x28] sm:$0xff]  ;;  %v70_v24 = vsub.s32 1, %v65_v23  ;;  %v66_v28 = vsub.s32 0, %v65_v23 }
  0x12   :  { %102 = vmatpush1.msra.mxu0 %v58_v4  ;;  %v48_v14 = vld [vmem:[#allocation2 + $0x20] sm:$0xff]  ;;  %v47_v15 = vld [vmem:[#allocation2 + $0x18] sm:$0xff]  ;;  %v46_v16 = vld [vmem:[#allocation2 + $0x10] sm:$0xff] }
  0x13   :  { %103 = vmatprep.subr.mxu0 %v57_v5  ;;  %v45_v17 = vld [vmem:[#allocation2 + $0x8] sm:$0xff]  ;;  %v44_v18 = vld [vmem:[#allocation2] sm:$0xff] }
  0x14   :  { %104 = vmatpush1.msra.mxu0 %v56_v6  ;;  %v43_v19 = vld [vmem:[%s627_s0] sm:$0xf]  ;;  %v182_v20 = vld [vmem:[%s630_s3 + $0x8] sm:$0x3] }
  0x15   :  { %105 = vmatprep.subr.mxu0 %v55_v7  ;;  %463 = vmatpush3.msk.msra.mxu1 %vm78_vm0, %v182_v20  ;;  %v181_v22 = vld [vmem:[%s630_s3] sm:$0xff]  ;;  %s520_s3 = smov 48   ;;  %v274_v39 = vld [vmem:[%s633_s6 + $0x8] sm:$0x3] }
  0x16   :  { %106 = vmatpush1.msra.mxu0 %v54_v8  ;;  %464 = vmatprep.subr.mxu1 %v518_v0  ;;  %v62_v25 = vld [vmem:[%s629_s2] sm:$0x3]  ;;  %s522_s2 = smov 88   ;;  %v272_v48 = vld [vmem:[%s632_s5 + $0x8] sm:$0x3] }
  0x17   :  { %107 = vmatprep.subr.mxu0 %v53_v9  ;;  %465 = vmatpush3.msra.mxu1 %v181_v22  ;;  %v71_v26 = vrot.slane %v62_v25, %v70_v24  ;;  %v67_v31 = vrot.slane %v62_v25, %v66_v28  ;;  %v273_v40 = vld [vmem:[%s633_s6] sm:$0xff] }
  0x18   :  { %108 = vmatpush1.msra.mxu0 %v52_v10  ;;  %469 = vmatprep.subr.mxu1 %v518_v0  ;;  %v445_v43 = vld [vmem:[%s631_s4] ss:$0 sm:$0xff]  ;;  %s524_s4 = smov 118  }
  0x19   :  { %109 = vmatprep.subr.mxu0 %v51_v11  ;;  %v271_v49 = vld [vmem:[%s632_s5] sm:$0xff] }
  0x1a   :  { %110 = vmatpush1.msra.mxu0 %v50_v12  ;;  %v452_v57 = vld [vmem:[%s634_s7] ss:$0 sm:$0xff] }
  0x1b   :  { %111 = vmatprep.subr.mxu0 %v49_v13 }
  0x1c   :  { %112 = vmatpush1.msra.mxu0 %v48_v14 }
  0x1d   :  { %113 = vmatprep.subr.mxu0 %v47_v15 }
  0x1e   :  { %114 = vmatpush1.msra.mxu0 %v46_v16 }
  0x1f   :  { %115 = vmatprep.subr.mxu0 %v45_v17 }
  0x20   :  { %116 = vmatpush1.msra.mxu0 %v44_v18 }
  0x21   :  { %444 = vmatmul.mubr.msk.f32.vlgmr.msra.gmra.mxu0 %vm74_vm1, %v43_v19 }
  0xe1   :  { %v151_v27 = vpop.f32.mrf.mxu0 }
  0xe2   :  { %v152_v33 = vadd.f32 %v151_v27, %v67_v31 }
  0xe3   :  { %v153_v29 = vpop.f32.mrf.mxu0 }
  0xe4   :  { %v154_v30 = vadd.f32 %v153_v29, %v71_v26 }
  0xe6   :  { %160 = vrot.lane.b32.xlu1 %v154_v30, %s520_s3  ;;  %v183_v32 = vmax.f32 %v154_v30, 0.0 }
  0xe8   :  { %192 = vrot.lane.b32.xlu0 %v183_v32, %s521_s18 }
  0xec   :  { %158 = vrot.lane.b32.xlu0 %v152_v33, %s520_s3 }
 0x158   :  { %v161_v35 = vpop.permute.xlu1 %160 }
 0x15a   :  { %v193_v34 = vpop.permute.xlu0 %192 }
 0x15b   :  { %467 = vmatmul.mubr.msk.f32.vlgmr.msra.gmra.mxu1 %vm194_vm3, %v193_v34 }
 0x15c   :  { %473 = vmatprep.mubr.msk.f32.mxu1 %vm519_vm2, %v518_v0  ;;  %470 = vmatpush3.msk.msra.mxu1 %vm78_vm0, %v274_v39 }
 0x15d   :  { %471 = vmatprep.subr.mxu1 %v518_v0 }
 0x15e   :  { %v159_v36 = vpop.permute.xlu0 %158  ;;  %472 = vmatpush3.msra.mxu1 %v273_v40 }
 0x15f   :  { %v163_v37 = vsel %vm162_vm4, %v159_v36, %v161_v35  ;;  %476 = vmatprep.subr.mxu1 %v518_v0 }
 0x160   :  { %v165_v38 = vmax.f32 %v152_v33, %v163_v37 }
 0x162   :  { %167 = vrot.lane.b32.xlu1 %v165_v38, %s522_s2 }
 0x1d4   :  { %v168_v41 = vpop.permute.xlu1 %167 }
 0x1d5   :  { %v170_v42 = vmax.f32 %v165_v38, %v168_v41 }
 0x1d7   :  { %172 = vrot.lane.b32.xlu0 %v170_v42, %s523_s23 }
 0x21b   :  { %v266_v44 = vpop.f32.mrf.mxu1 }
 0x21c   :  { %v267_v45 = vadd.f32 %v445_v43, %v266_v44 }
 0x21d   :  { %v468_v46 = vpop.f32.mrf.mxu1 }
 0x21e   :  { %v270_v47 = vmax.f32 %v267_v45, 0.0 }
 0x220   :  { %474 = vmatmul.mubr.msk.f32.vlgmr.msra.gmra.mxu1 %vm194_vm3, %v270_v47 }
 0x221   :  { %477 = vmatpush3.msk.msra.mxu1 %vm78_vm0, %v272_v48  ;;  %480 = vmatprep.mubr.msk.f32.mxu1 %vm519_vm2, %v518_v0 }
 0x222   :  { %478 = vmatprep.subr.mxu1 %v518_v0 }
 0x223   :  { %479 = vmatpush3.msra.mxu1 %v271_v49 }
 0x249   :  { %v173_v50 = vpop.permute.xlu0 %172 }
 0x24a   :  { %v175_v51 = vmax.f32 %v170_v42, %v173_v50 }
 0x24c   :  { %177 = vrot.lane.b32.xlu1 %v175_v51, %s524_s4 }
 0x2be   :  { %v178_v52 = vpop.permute.xlu1 %177 }
 0x2bf   :  { %v180_v53 = vmax.f32 %v175_v51, %v178_v52 }
 0x2c1   :  { %481 = vmatmul.mubr.msk.f32.vlgmr.msra.gmra.mxu1 %vm194_vm3, %v180_v53 }
 0x2e0   :  { %v347_v54 = vpop.f32.mrf.mxu1 }
 0x2e2   :  { %v475_v55 = vpop.f32.mrf.mxu1 }
 0x381   :  { %v423_v56 = vpop.f32.mrf.mxu1 }
 0x382   :  { %v424_v58 = vadd.f32 %v423_v56, %v347_v54 }
 0x383   :  { %v482_v59 = vpop.f32.mrf.mxu1 }
 0x384   :  { %v434_v60 = vadd.f32 %v452_v57, %v424_v58 }
 0x386   :  { %436 = vst.msk [vmem:[%s635_s8] sm:$0xf] %vm435_vm5, %v434_v60 }
 0x387   :  { %441 = vsyncpa [#allocation3], 1 }

</bundles_post_ra>
